<compile_context>
chip_gen: v6e
topology: v6e:2x2x1
jax: 0.10.0
libtpu: 0.0.40
codegen_flags: <defaults>
</compile_context>

<pallas_src>
import functools

import jax
import jax.numpy as jnp
from jax.experimental import pallas as pl
from jax.experimental.pallas import tpu as pltpu


def _layer_conv_kernel(x_ref, w_ref, scale_ref, shift_ref, out_ref, *,
                       K, KC, KC_pad, F, F_pad, L_out, P, P8,
                       stride, S, pool_size, pool_stride, pool_pad, activation):
    """One batch block per grid step; everything after the input DMA stays in vregs.

    x_ref:     (B, S, LpS, C)   bf16 phase-split, zero-padded input block
    w_ref:     (KC_pad, F_pad)  bf16 im2col conv weight (zero padded)
    scale_ref: (1, F_pad)       f32 folded BN scale
    shift_ref: (1, F_pad)       f32 folded conv-bias + BN shift
    out_ref:   (B, P, F_pad)    f32 pooled output block
    """
    B = x_ref.shape[0]
    M = B * P8

    w = w_ref[...]                       # hoisted, reused by every pool tap
    scale = scale_ref[...]
    shift = shift_ref[...]

    # Static per-pool-tap valid row ranges: conv position c = j*pool_stride + q
    # - pool_pad must lie in [0, L_out); rows outside contribute -inf
    # (PyTorch MaxPool1d pads with -inf).
    bounds = []
    for q in range(pool_size):
        d = pool_pad - q
        j_lo = 0 if d <= 0 else -(-d // pool_stride)
        j_hi = max(j_lo, min(P, (L_out - 1 + pool_pad - q) // pool_stride + 1))
        bounds.append((j_lo, j_hi))
    need_mask = pool_size > 1 and any(lo > 0 or hi < P for lo, hi in bounds)

    row_j = None
    if need_mask:
        row_j = jax.lax.broadcasted_iota(jnp.int32, (M, F_pad), 0) % P8
    lane = None
    if activation == "softmax":
        lane = jax.lax.broadcasted_iota(jnp.int32, (M, F_pad), 1)

    pooled = None
    for q in range(pool_size):
        # im2col LHS for pool-tap q, built entirely in registers: K unit-stride
        # tap slices concatenated along lanes + zero lanes up to KC_pad.
        taps = []
        for k in range(K):
            start = q * stride + k          # flat padded-x offset of (q, k, j=0)
            taps.append(x_ref[:, start % S, start // S:start // S + P8, :])
        if KC_pad > KC:
            taps.append(jnp.zeros((B, P8, KC_pad - KC), x_ref.dtype))
        lhs = jnp.concatenate(taps, axis=-1).reshape(M, KC_pad)   # layout-preserving

        # conv as one MXU contraction (bf16 in, f32 accumulate) ...
        z = jnp.dot(lhs, w, preferred_element_type=jnp.float32)   # (M, F_pad)
        # ... fused conv-bias + eval-mode BN affine + activation, once per slab
        z = z * scale + shift
        if activation == "relu":
            a = jnp.maximum(z, 0.0)
        elif activation == "sigmoid":
            a = jax.nn.sigmoid(z)
        elif activation == "softmax":
            # TODO(synk): nn.Softmax() uses an implicit dim in PyTorch; softmax is
            # taken over the channel axis here, masking the padded F_pad lanes.
            a = jax.nn.softmax(jnp.where(lane < F, z, -jnp.inf), axis=-1)
        else:
            a = z

        # -inf the pool-halo rows this tap does not cover, then running max.
        j_lo, j_hi = bounds[q]
        if need_mask and (j_lo > 0 or j_hi < P):
            a = jnp.where((row_j >= j_lo) & (row_j < j_hi), a, -jnp.inf)
        pooled = a if pooled is None else jnp.maximum(pooled, a)

    # single lane-dense store of the pooled block (rows [P, P8) are dropped)
    out_ref[...] = pooled.reshape(B, P8, F_pad)[:, :P, :].astype(out_ref.dtype)


def layer_conv_forward(x_ncl, weight_oik, bias, gamma, beta,
                       running_mean, running_var, *,
                       stride=1, pool_size=2, pool_stride=None,
                       activation="relu", batch_norm=True, eps=1e-5,
                       b_blk=None, compute_dtype=jnp.bfloat16):
    """x_ncl: (N, C_in, L) float32, PyTorch NCL layout. Returns (N, F, P)."""
    N, C, L = x_ncl.shape
    F, _, K = weight_oik.shape               # PyTorch Conv1d weight (out, in, K)

    stride = 1 if stride is None else int(stride)
    if pool_size is None:                     # module skips the pooling sub-layer
        pool_size, pool_stride = 1, 1
    elif pool_stride is None:
        pool_stride = int(pool_size)
    pool_size, pool_stride = int(pool_size), int(pool_stride)

    pad = K // 2
    pool_pad = pool_size // 2
    L_out = (L + 2 * pad - K) // stride + 1
    P = (L_out + 2 * pool_pad - pool_size) // pool_stride + 1
    P8 = ((P + 7) // 8) * 8                   # layout-preserving reshapes in-kernel
    S = stride * pool_stride                  # combined row step folded into gather

    KC = K * C
    KC_pad = ((KC + 127) // 128) * 128        # MXU contraction depth (lane aligned)
    F_pad = ((F + 127) // 128) * 128          # lane-dense output stores

    # zero pad the sequence so every (pool-tap, conv-tap, row) access is in bounds
    PL = pool_pad * stride + pad
    max_start = (pool_size - 1) * stride + (K - 1)
    Lp = max(max_start + 1 + (P8 - 1) * S, L + PL)
    Lp = ((Lp + S - 1) // S) * S              # phase split requires S | Lp
    LpS = Lp // S

    # ---- batch blocking: M >= 256 MXU rows, >= 4 grid steps, VMEM cap ----------
    if b_blk is None:
        b_mxu = max(1, -(-256 // P8))         # B_BLK*P8 >= 256 (v6e/v7x MXU M fill)
        b_steps = max(1, N // 4)              # >= 4 grid steps (>= 2 per TC on v7x)
        B_BLK = max(1, min(b_mxu, b_steps, N))
    else:
        B_BLK = max(1, min(int(b_blk), N))
    # per-step VMEM: double-buffered in/out blocks + in-flight matmul/pool slabs
    per_b = (2 * Lp * C * 2 + 2 * P * F_pad * 4
             + pool_size * P8 * (KC_pad * 2 + 2 * F_pad * 4))
    while B_BLK > 1 and per_b * B_BLK > 24 * 1024 * 1024:
        B_BLK -= 1
    n_blk = -(-N // B_BLK)
    N_pad = n_blk * B_BLK

    # ---- host-side glue: channels-last bf16, zero pad, phase split by S --------
    x_nlc = jnp.transpose(x_ncl, (0, 2, 1)).astype(compute_dtype)        # (N, L, C)
    x_p = jnp.pad(x_nlc, ((0, N_pad - N), (PL, Lp - L - PL), (0, 0)))    # (N_pad, Lp, C)
    x_ps = x_p.reshape(N_pad, LpS, S, C).transpose(0, 2, 1, 3)           # (N_pad, S, LpS, C)

    # im2col weight: (F, C, K) -> (K, C, F) -> (K*C, F), zero padded
    w2 = jnp.transpose(weight_oik, (2, 1, 0)).reshape(KC, F).astype(jnp.float32)
    w2 = jnp.pad(w2, ((0, KC_pad - KC), (0, F_pad - F))).astype(compute_dtype)

    # fold conv bias + eval-mode batchnorm into a per-channel scale/shift
    if batch_norm:
        inv_std = 1.0 / jnp.sqrt(running_var.astype(jnp.float32) + eps)
        scale = gamma.astype(jnp.float32) * inv_std
        shift = (beta.astype(jnp.float32)
                 - running_mean.astype(jnp.float32) * scale
                 + bias.astype(jnp.float32) * scale)
    else:
        scale = jnp.ones((F,), jnp.float32)
        shift = bias.astype(jnp.float32)
    scale = jnp.pad(scale, (0, F_pad - F)).reshape(1, F_pad)
    shift = jnp.pad(shift, (0, F_pad - F)).reshape(1, F_pad)

    kernel = functools.partial(
        _layer_conv_kernel, K=K, KC=KC, KC_pad=KC_pad, F=F, F_pad=F_pad,
        L_out=L_out, P=P, P8=P8, stride=stride, S=S, pool_size=pool_size,
        pool_stride=pool_stride, pool_pad=pool_pad,
        activation=activation.lower())

    out = pl.pallas_call(
        kernel,
        out_shape=jax.ShapeDtypeStruct((N_pad, P, F_pad), jnp.float32),
        grid_spec=pltpu.PrefetchScalarGridSpec(
            num_scalar_prefetch=0,
            grid=(n_blk,),
            in_specs=[
                pl.BlockSpec((B_BLK, S, LpS, C), lambda n: (n, 0, 0, 0)),
                pl.BlockSpec((KC_pad, F_pad), lambda n: (0, 0)),
                pl.BlockSpec((1, F_pad), lambda n: (0, 0)),
                pl.BlockSpec((1, F_pad), lambda n: (0, 0)),
            ],
            out_specs=pl.BlockSpec((B_BLK, P, F_pad), lambda n: (n, 0, 0)),
        ),
        compiler_params=pltpu.CompilerParams(
            dimension_semantics=("parallel",),
            # per-step blocks are capped at ~24 MiB above, so a 32 MiB scoped
            # budget holds on v5e/v6e (128 MiB) and v7x (64 MiB physical)
            vmem_limit_bytes=32 * 1024 * 1024,
        ),
    )(x_ps, w2, scale, shift)

    # strip batch / channel padding and go back to PyTorch (N, F, P)
    return jnp.transpose(out[:N, :, :F], (0, 2, 1))


def _reference_forward(x, w, b, gamma, beta, mean, var, *,
                       stride, pool_size, pool_stride, eps=1e-5):
    """Pure-JAX reference mirroring the PyTorch module (eval mode, relu)."""
    K = w.shape[-1]
    out = jax.lax.conv_general_dilated(
        x, w, window_strides=(stride,), padding=((K // 2, K // 2),),
        dimension_numbers=("NCH", "OIH", "NCH"),
        precision=jax.lax.Precision.HIGHEST)
    out = out + b[None, :, None]
    out = (out - mean[None, :, None]) / jnp.sqrt(var[None, :, None] + eps)
    out = out * gamma[None, :, None] + beta[None, :, None]
    out = jnp.maximum(out, 0.0)
    pp = pool_size // 2
    out = jax.lax.reduce_window(
        out, -jnp.inf, jax.lax.max,
        window_dimensions=(1, 1, pool_size),
        window_strides=(1, 1, pool_stride),
        padding=((0, 0), (0, 0), (pp, pp)))
    return out


if __name__ == "__main__":
    # module config (small, consistent with LayerConv.__init__)
    N, C_IN, L = 16, 4, 16
    FILTERS, FILTER_WIDTH, STRIDE = 8, 3, 1
    POOL_SIZE, POOL_STRIDE = 2, 2

    key = jax.random.PRNGKey(0)
    kx, kw, kb, kg, kbe, km, kv = jax.random.split(key, 7)

    x = jax.random.normal(kx, (N, C_IN, L), dtype=jnp.float32)
    # deterministic parameter init (synthetic - not a checkpoint load)
    weight = jax.random.normal(kw, (FILTERS, C_IN, FILTER_WIDTH), jnp.float32) * 0.1
    bias = jax.random.normal(kb, (FILTERS,), jnp.float32) * 0.1
    gamma = 1.0 + 0.1 * jax.random.normal(kg, (FILTERS,), jnp.float32)
    beta = 0.1 * jax.random.normal(kbe, (FILTERS,), jnp.float32)
    running_mean = 0.1 * jax.random.normal(km, (FILTERS,), jnp.float32)
    running_var = jnp.abs(1.0 + 0.1 * jax.random.normal(kv, (FILTERS,), jnp.float32))

    out = layer_conv_forward(
        x, weight, bias, gamma, beta, running_mean, running_var,
        stride=STRIDE, pool_size=POOL_SIZE, pool_stride=POOL_STRIDE,
        activation="relu", batch_norm=True)
    out = jax.block_until_ready(out)

    # reference on bf16-rounded x / w (the kernel feeds the MXU in bf16 and
    # accumulates in f32); everything after the matmul is f32 in both paths.
    xq = x.astype(jnp.bfloat16).astype(jnp.float32)
    wq = weight.astype(jnp.bfloat16).astype(jnp.float32)
    ref = _reference_forward(
        xq, wq, bias, gamma, beta, running_mean, running_var,
        stride=STRIDE, pool_size=POOL_SIZE, pool_stride=POOL_STRIDE)

    assert out.shape == ref.shape, (out.shape, ref.shape)
    max_err = float(jnp.max(jnp.abs(out - ref)))
    assert jnp.allclose(out, ref, atol=1e-3, rtol=1e-3), max_err

    print("KERNEL_OK")
</pallas_src>

<mosaic_0001>
module attributes {stable_mosaic.version = 11 : i64} {
  func.func @_layer_conv_kernel(%arg0: i32, %arg1: memref<4x2x17x4xbf16, #tpu.memory_space<vmem>>, %arg2: memref<128x128xbf16, #tpu.memory_space<vmem>>, %arg3: memref<1x128xf32, #tpu.memory_space<vmem>>, %arg4: memref<1x128xf32, #tpu.memory_space<vmem>>, %arg5: memref<4x9x128xf32, #tpu.memory_space<vmem>>) attributes {dimension_semantics = [#tpu.dimension_semantics<parallel>], iteration_bounds = array<i64: 4>, scalar_prefetch = 0 : i64, scratch_operands = 0 : i64, tpu.core_type = #tpu.core_type<tc>, window_params = [{transform_indices = @transform_0, window_bounds = array<i64: 4, 2, 17, 4>}, {pipeline_mode = #tpu.pipeline_mode<synchronous>, transform_indices = @transform_1, window_bounds = array<i64: 128, 128>}, {pipeline_mode = #tpu.pipeline_mode<synchronous>, transform_indices = @transform_2, window_bounds = array<i64: 1, 128>}, {pipeline_mode = #tpu.pipeline_mode<synchronous>, transform_indices = @transform_3, window_bounds = array<i64: 1, 128>}, {transform_indices = @transform_4, window_bounds = array<i64: 4, 9, 128>}]} {
    %c0 = arith.constant 0 : index
    %c0_0 = arith.constant 0 : index
    %0 = vector.load %arg2[%c0, %c0_0] : memref<128x128xbf16, #tpu.memory_space<vmem>>, vector<128x128xbf16>
    %c0_1 = arith.constant 0 : index
    %c0_2 = arith.constant 0 : index
    %1 = vector.load %arg3[%c0_1, %c0_2] : memref<1x128xf32, #tpu.memory_space<vmem>>, vector<1x128xf32>
    %c0_3 = arith.constant 0 : index
    %c0_4 = arith.constant 0 : index
    %2 = vector.load %arg4[%c0_3, %c0_4] : memref<1x128xf32, #tpu.memory_space<vmem>>, vector<1x128xf32>
    %3 = tpu.iota {dimensions = array<i32: 0>} : vector<64x128xi32>
    %c16_i32 = arith.constant 16 : i32
    %c0_i32 = arith.constant 0 : i32
    %4 = arith.cmpi eq, %c16_i32, %c0_i32 : i32
    %c1_i32 = arith.constant 1 : i32
    %5 = arith.select %4, %c1_i32, %c16_i32 : i32
    %6 = vector.broadcast %5 : i32 to vector<64x128xi32>
    %7 = arith.remsi %3, %6 : vector<64x128xi32>
    %c0_i32_5 = arith.constant 0 : i32
    %8 = vector.broadcast %c0_i32_5 : i32 to vector<64x128xi32>
    %9 = arith.cmpi ne, %7, %8 : vector<64x128xi32>
    %c0_i32_6 = arith.constant 0 : i32
    %10 = vector.broadcast %c0_i32_6 : i32 to vector<64x128xi32>
    %11 = arith.cmpi slt, %7, %10 : vector<64x128xi32>
    %c0_i32_7 = arith.constant 0 : i32
    %12 = arith.cmpi slt, %5, %c0_i32_7 : i32
    %13 = vector.broadcast %12 : i1 to vector<64x128xi1>
    %14 = vector.broadcast %13 : vector<64x128xi1> to vector<64x128xi1>
    %15 = arith.xori %11, %14 : vector<64x128xi1>
    %16 = arith.andi %15, %9 : vector<64x128xi1>
    %17 = vector.broadcast %5 : i32 to vector<64x128xi32>
    %18 = arith.addi %7, %17 : vector<64x128xi32>
    %19 = arith.select %16, %18, %7 : vector<64x128xi1>, vector<64x128xi32>
    %c0_8 = arith.constant 0 : index
    %c0_9 = arith.constant 0 : index
    %c0_10 = arith.constant 0 : index
    %c0_11 = arith.constant 0 : index
    %20 = vector.load %arg1[%c0_8, %c0_9, %c0_10, %c0_11] : memref<4x2x17x4xbf16, #tpu.memory_space<vmem>>, vector<4x1x16x4xbf16>
    %21 = vector.shape_cast %20 : vector<4x1x16x4xbf16> to vector<4x16x4xbf16>
    %c0_12 = arith.constant 0 : index
    %c1 = arith.constant 1 : index
    %c0_13 = arith.constant 0 : index
    %c0_14 = arith.constant 0 : index
    %22 = vector.load %arg1[%c0_12, %c1, %c0_13, %c0_14] : memref<4x2x17x4xbf16, #tpu.memory_space<vmem>>, vector<4x1x16x4xbf16>
    %23 = vector.shape_cast %22 : vector<4x1x16x4xbf16> to vector<4x16x4xbf16>
    %c0_15 = arith.constant 0 : index
    %c0_16 = arith.constant 0 : index
    %c1_17 = arith.constant 1 : index
    %c0_18 = arith.constant 0 : index
    %24 = vector.load %arg1[%c0_15, %c0_16, %c1_17, %c0_18] : memref<4x2x17x4xbf16, #tpu.memory_space<vmem>>, vector<4x1x16x4xbf16>
    %25 = vector.shape_cast %24 : vector<4x1x16x4xbf16> to vector<4x16x4xbf16>
    %cst = arith.constant 0.000000e+00 : bf16
    %26 = vector.broadcast %cst : bf16 to vector<4x16x116xbf16>
    %27 = tpu.concatenate %21, %23, %25, %26 in 2 : vector<4x16x4xbf16>, vector<4x16x4xbf16>, vector<4x16x4xbf16>, vector<4x16x116xbf16> -> vector<4x16x128xbf16>
    %28 = vector.shape_cast %27 : vector<4x16x128xbf16> to vector<64x128xbf16>
    %cst_19 = arith.constant dense<0.000000e+00> : vector<64x128xf32>
    %29 = tpu.matmul %28, %0, %cst_19 {dimension_numbers = #tpu.dot_dimension_numbers<[1], [0], [0], [1], [0, 0, 1, 1], [], []>} : vector<64x128xbf16>, vector<128x128xbf16>, vector<64x128xf32> -> vector<64x128xf32>
    %30 = vector.broadcast %1 : vector<1x128xf32> to vector<64x128xf32>
    %31 = arith.mulf %29, %30 : vector<64x128xf32>
    %32 = vector.broadcast %2 : vector<1x128xf32> to vector<64x128xf32>
    %33 = arith.addf %31, %32 : vector<64x128xf32>
    %cst_20 = arith.constant 0.000000e+00 : f32
    %34 = vector.broadcast %cst_20 : f32 to vector<64x128xf32>
    %35 = arith.maximumf %33, %34 : vector<64x128xf32>
    %c1_i32_21 = arith.constant 1 : i32
    %36 = vector.broadcast %c1_i32_21 : i32 to vector<64x128xi32>
    %37 = arith.cmpi sge, %19, %36 : vector<64x128xi32>
    %c9_i32 = arith.constant 9 : i32
    %38 = vector.broadcast %c9_i32 : i32 to vector<64x128xi32>
    %39 = arith.cmpi slt, %19, %38 : vector<64x128xi32>
    %40 = arith.andi %37, %39 : vector<64x128xi1>
    %cst_22 = arith.constant 0xFF800000 : f32
    %41 = vector.broadcast %cst_22 : f32 to vector<64x128xf32>
    %42 = arith.select %40, %35, %41 : vector<64x128xi1>, vector<64x128xf32>
    %c0_23 = arith.constant 0 : index
    %c1_24 = arith.constant 1 : index
    %c0_25 = arith.constant 0 : index
    %c0_26 = arith.constant 0 : index
    %43 = vector.load %arg1[%c0_23, %c1_24, %c0_25, %c0_26] : memref<4x2x17x4xbf16, #tpu.memory_space<vmem>>, vector<4x1x16x4xbf16>
    %44 = vector.shape_cast %43 : vector<4x1x16x4xbf16> to vector<4x16x4xbf16>
    %c0_27 = arith.constant 0 : index
    %c0_28 = arith.constant 0 : index
    %c1_29 = arith.constant 1 : index
    %c0_30 = arith.constant 0 : index
    %45 = vector.load %arg1[%c0_27, %c0_28, %c1_29, %c0_30] : memref<4x2x17x4xbf16, #tpu.memory_space<vmem>>, vector<4x1x16x4xbf16>
    %46 = vector.shape_cast %45 : vector<4x1x16x4xbf16> to vector<4x16x4xbf16>
    %c0_31 = arith.constant 0 : index
    %c1_32 = arith.constant 1 : index
    %c1_33 = arith.constant 1 : index
    %c0_34 = arith.constant 0 : index
    %47 = vector.load %arg1[%c0_31, %c1_32, %c1_33, %c0_34] : memref<4x2x17x4xbf16, #tpu.memory_space<vmem>>, vector<4x1x16x4xbf16>
    %48 = vector.shape_cast %47 : vector<4x1x16x4xbf16> to vector<4x16x4xbf16>
    %cst_35 = arith.constant 0.000000e+00 : bf16
    %49 = vector.broadcast %cst_35 : bf16 to vector<4x16x116xbf16>
    %50 = tpu.concatenate %44, %46, %48, %49 in 2 : vector<4x16x4xbf16>, vector<4x16x4xbf16>, vector<4x16x4xbf16>, vector<4x16x116xbf16> -> vector<4x16x128xbf16>
    %51 = vector.shape_cast %50 : vector<4x16x128xbf16> to vector<64x128xbf16>
    %cst_36 = arith.constant dense<0.000000e+00> : vector<64x128xf32>
    %52 = tpu.matmul %51, %0, %cst_36 {dimension_numbers = #tpu.dot_dimension_numbers<[1], [0], [0], [1], [0, 0, 1, 1], [], []>} : vector<64x128xbf16>, vector<128x128xbf16>, vector<64x128xf32> -> vector<64x128xf32>
    %53 = vector.broadcast %1 : vector<1x128xf32> to vector<64x128xf32>
    %54 = arith.mulf %52, %53 : vector<64x128xf32>
    %55 = vector.broadcast %2 : vector<1x128xf32> to vector<64x128xf32>
    %56 = arith.addf %54, %55 : vector<64x128xf32>
    %cst_37 = arith.constant 0.000000e+00 : f32
    %57 = vector.broadcast %cst_37 : f32 to vector<64x128xf32>
    %58 = arith.maximumf %56, %57 : vector<64x128xf32>
    %c0_i32_38 = arith.constant 0 : i32
    %59 = vector.broadcast %c0_i32_38 : i32 to vector<64x128xi32>
    %60 = arith.cmpi sge, %19, %59 : vector<64x128xi32>
    %c8_i32 = arith.constant 8 : i32
    %61 = vector.broadcast %c8_i32 : i32 to vector<64x128xi32>
    %62 = arith.cmpi slt, %19, %61 : vector<64x128xi32>
    %63 = arith.andi %60, %62 : vector<64x128xi1>
    %cst_39 = arith.constant 0xFF800000 : f32
    %64 = vector.broadcast %cst_39 : f32 to vector<64x128xf32>
    %65 = arith.select %63, %58, %64 : vector<64x128xi1>, vector<64x128xf32>
    %66 = arith.maximumf %42, %65 : vector<64x128xf32>
    %67 = vector.shape_cast %66 : vector<64x128xf32> to vector<4x16x128xf32>
    %68 = vector.extract_strided_slice %67 {offsets = [0, 0, 0], sizes = [4, 9, 128], strides = [1, 1, 1]} : vector<4x16x128xf32> to vector<4x9x128xf32>
    %c0_40 = arith.constant 0 : index
    %c0_41 = arith.constant 0 : index
    %c0_42 = arith.constant 0 : index
    %69 = vector.load %arg5[%c0_40, %c0_41, %c0_42] : memref<4x9x128xf32, #tpu.memory_space<vmem>>, vector<4x9x128xf32>
    tpu.vector_store %arg5[%c0_40, %c0_41, %c0_42], %68 {strides = array<i32>} : memref<4x9x128xf32, #tpu.memory_space<vmem>>, vector<4x9x128xf32>,
    return
  }
  func.func @transform_0(%arg0: i32) -> (i32, i32, i32, i32) {
    %c0_i32 = arith.constant 0 : i32
    %c0_i32_0 = arith.constant 0 : i32
    %c0_i32_1 = arith.constant 0 : i32
    %c0_i32_2 = arith.constant 0 : i32
    return %arg0, %c0_i32, %c0_i32_0, %c0_i32_1 : i32, i32, i32, i32
  }
  func.func @transform_1(%arg0: i32) -> (i32, i32) {
    %c0_i32 = arith.constant 0 : i32
    %c0_i32_0 = arith.constant 0 : i32
    %c0_i32_1 = arith.constant 0 : i32
    return %c0_i32, %c0_i32_0 : i32, i32
  }
  func.func @transform_2(%arg0: i32) -> (i32, i32) {
    %c0_i32 = arith.constant 0 : i32
    %c0_i32_0 = arith.constant 0 : i32
    %c0_i32_1 = arith.constant 0 : i32
    return %c0_i32, %c0_i32_0 : i32, i32
  }
  func.func @transform_3(%arg0: i32) -> (i32, i32) {
    %c0_i32 = arith.constant 0 : i32
    %c0_i32_0 = arith.constant 0 : i32
    %c0_i32_1 = arith.constant 0 : i32
    return %c0_i32, %c0_i32_0 : i32, i32
  }
  func.func @transform_4(%arg0: i32) -> (i32, i32, i32) {
    %c0_i32 = arith.constant 0 : i32
    %c0_i32_0 = arith.constant 0 : i32
    %c0_i32_1 = arith.constant 0 : i32
    return %arg0, %c0_i32, %c0_i32_0 : i32, i32, i32
  }
}

</mosaic_0001>

<bundles_post_ra>
// kernel: tpu_custom_call.1
= control target key start
LH: loop header
LB: loop body
LE: loop exit
PB: predicated region body
PF: predicated region fallthrough
CT: control target
= control target key end

     0   :  { %s1225_s15 = smov 0   ;;  %s1426_s0 = inlined_call_operand.vmem [shape: bf16[16,2,17,4], index: 0, kind: input, shape index: {}]   ;;  %s1427_s1 = inlined_call_operand.vmem [shape: bf16[128,128], index: 1, kind: input, shape index: {}]   ;;  %s1428_s2 = inlined_call_operand.vmem [shape: f32[1,128], index: 2, kind: input, shape index: {}]   ;;  %s1429_s3 = inlined_call_operand.vmem [shape: f32[1,128], index: 3, kind: input, shape index: {}]   ;;  %s1430_s4 = inlined_call_operand.vmem [shape: f32[16,9,128], index: 4, kind: output, shape index: {}]  }
   0x1 LB: > { %s1008_s16 = sadd.s32 4294967295, %s1196_s15   ;;  %p1012_p0 = scmp.ge.s32.totalorder %s1196_s15, 1  ;;  %s1196_s15 = sphi %s1225_s15, %s14_s15  }
   0x2   : > { %p164_p1 = scmp.lt.s32.totalorder %s1196_s15, 5 }
   0x4   : > { %p165_p2 = pnand %p1012_p0, %p164_p1 }
   0x5   : > { %s1013_s17 = sshll.u32 (!%p165_p2), %s1008_s16, 2  ;;  %s1198_s30 = smov (!%p165_p2), 4  }
   0x6   : > { %168 = sbr.rel (%p165_p2) target bundleno = 368 (0x170), region = 36  ;;  %p193_p3 = scmp.lt.s32.totalorder (!%p165_p2), %s1013_s17, 15 }
   0x7   : > { %s1199_s11 = smov (!%p165_p2), 8  }
   0xb   : > { %v1182_v0 = vld [vmem:[%s1427_s1 + $0x38] sm:$0xff]   ;;  %v1183_v1 = vld [vmem:[%s1427_s1 + $0x30] sm:$0xff]   ;;  %s1434_s17 = smov (!%p193_p3, %s1013_s17), 15  ;;  %v1184_v2 = vld [vmem:[%s1427_s1 + $0x28] sm:$0xff]   ;;  %vm411_vm0 = vsmask.f32 7424 }
   0xc   : > { %1103 = vmatprep.subr.bf16.mxu0 %v1182_v0  ;;  %1127 = vmatprep.subr.bf16.mxu1 %v1182_v0  ;;  %s1151_s22 = smul.u32 24, %s1434_s17  ;;  %v1185_v3 = vld [vmem:[%s1427_s1 + $0x20] sm:$0xff]   ;;  %v1186_v7 = vld [vmem:[%s1427_s1 + $0x18] sm:$0xff]   ;;  %v1187_v17 = vld [vmem:[%s1427_s1 + $0x10] sm:$0xff]   ;;  %vm468_vm1 = vcmask 31744   ;;  %vm477_vm2 = vcmask 64512  }
   0xd   : > { %1104 = vmatpush3.bf16.msra.mxu0 %v1182_v0  ;;  %1128 = vmatpush3.bf16.msra.mxu1 %v1182_v0  ;;  %v1188_v31 = vld [vmem:[%s1427_s1 + $0x8] sm:$0xff]   ;;  %vm486_vm3 = vcmask 97280   ;;  %s1078_s20 = sshll.u32 %s1434_s17, 4 }
   0xe   : > { %1105 = vmatprep.subr.bf16.mxu0 %v1183_v1  ;;  %1129 = vmatprep.subr.bf16.mxu1 %v1183_v1  ;;  %s1248_s27 = scalar_lea.vmem %s1426_s0, %s1151_s22  ;;  %s1390_s23 = scalar_lea.vmem %s1430_s4, %s1078_s20 }
   0xf   : > { %v1254_v4 = vld [vmem:[%s1248_s27 + $0xc] sm:$0xff]   ;;  %v1257_v5 = vld [vmem:[%s1248_s27 + $0x54] sm:$0xff]   ;;  %v1262_v6 = vld [vmem:[%s1248_s27 + $0x24] sm:$0xff]  }
  0x10   : > { %391 = vrot.lane.b32.xlu0 %v1254_v4, %s1198_s30  ;;  %397 = vrot.lane.b32.xlu1 %v1257_v5, %s1198_s30  ;;  %v1270_v8 = vld [vmem:[%s1248_s27] sm:$0xff]   ;;  %v1166_v9 = vld [vmem:[%s1248_s27 + $0x8] ss:$0 sps:$4 sm:$0x11]  }
  0x11   : > { %1106 = vmatpush3.bf16.msra.mxu0 %v1183_v1  ;;  %1130 = vmatpush3.bf16.msra.mxu1 %v1183_v1  ;;  %v1274_v10 = vld [vmem:[%s1248_s27 + $0x3c] sm:$0xff]   ;;  %v413_v11 = vshrl.u32 %v1270_v8, 16  ;;  %v415_v12 = vshll.u32 %v1270_v8, 16  ;;  %v420_v13 = vshll.u32 %v1166_v9, 16  ;;  %v1170_v16 = vld [vmem:[%s1248_s27 + $0xc] sm:$0xff]   ;;  %v1172_v28 = vld [vmem:[%s1248_s27 + $0x24] sm:$0xff]  }
  0x12   : > { %1107 = vmatprep.subr.bf16.mxu0 %v1184_v2  ;;  %1131 = vmatprep.subr.bf16.mxu1 %v1184_v2  ;;  %v1281_v14 = vld [vmem:[%s1248_s27 + $0x18] sm:$0xff]   ;;  %v1169_v15 = vld [vmem:[%s1248_s27 + $0x20] ss:$0 sps:$4 sm:$0x11]   ;;  %v730_v23 = vshrl.u32 %v1170_v16, 16  ;;  %v732_v27 = vshll.u32 %v1170_v16, 16 }
  0x13   : > { %v417_v18 = vrot.slane %v415_v12, 1  ;;  %v422_v19 = vrot.slane %v420_v13, 1  ;;  %v425_v20 = vshrl.u32 %v1281_v14, 16  ;;  %v427_v21 = vshll.u32 %v1281_v14, 16  ;;  %v1295_v30 = vld [vmem:[%s1248_s27 + $0x30] sm:$0xff]   ;;  %v1309_v47 = vld [vmem:[%s1248_s27 + $0x48] sm:$0xff]  }
  0x14   : > { %393 = vrot.lane.b32.xlu0 %v1262_v6, %s1198_s30  ;;  %v432_v22 = vshll.u32 %v1169_v15, 16  ;;  %v1171_v26 = vld [vmem:[%s1248_s27 + $0x14] ss:$0 sps:$4 sm:$0x11]   ;;  %v734_v34 = vrot.slane %v732_v27, 1  ;;  %v742_v37 = vshrl.u32 %v1172_v28, 16 }
  0x15   : > { %1108 = vmatpush3.bf16.msra.mxu0 %v1184_v2  ;;  %1132 = vmatpush3.bf16.msra.mxu1 %v1184_v2  ;;  %v418_v24 = vor.u32 %v417_v18, %v413_v11  ;;  %v429_v25 = vrot.slane %v427_v21, 1  ;;  %v737_v35 = vshll.u32 %v1171_v26, 16  ;;  %v1173_v36 = vld [vmem:[%s1248_s27 + $0x2c] ss:$0 sps:$4 sm:$0x11]   ;;  %v744_v38 = vshll.u32 %v1172_v28, 16 }
  0x16   : > { %1109 = vmatprep.subr.bf16.mxu0 %v1185_v3  ;;  %1133 = vmatprep.subr.bf16.mxu1 %v1185_v3  ;;  %v434_v29 = vrot.slane %v432_v22, 1  ;;  %v437_v39 = vshrl.u32 %v1295_v30, 16  ;;  %v735_v41 = vor.u32 %v734_v34, %v730_v23  ;;  %v439_v43 = vshll.u32 %v1295_v30, 16  ;;  %v1175_v46 = vld [vmem:[%s1248_s27 + $0x38] ss:$0 sps:$4 sm:$0x11]  }
  0x17   : > { %v423_v32 = vsel %vm411_vm0, %v418_v24, %v422_v19  ;;  %v430_v33 = vor.u32 %v429_v25, %v425_v20  ;;  %v739_v42 = vrot.slane %v737_v35, 1  ;;  %v746_v44 = vrot.slane %v744_v38, 1  ;;  %v1178_v50 = vld [vmem:[%s1248_s27 + $0x3c] sm:$0xff]   ;;  %v1180_v55 = vld [vmem:[%s1248_s27 + $0x54] sm:$0xff]  }
  0x18   : > { %395 = vrot.lane.b32.xlu0 %v1274_v10, %s1198_s30  ;;  %460 = vrot.lane.b32.xlu1 %v423_v32, %s1199_s11  ;;  %v749_v45 = vshll.u32 %v1173_v36, 16  ;;  %v441_v49 = vrot.slane %v439_v43, 1  ;;  %v444_v53 = vshll.u32 %v1175_v46, 16  ;;  %v449_v54 = vshrl.u32 %v1309_v47, 16  ;;  %v1189_v15 = vld [vmem:[%s1427_s1] sm:$0xff]  }
  0x19   : > { %1110 = vmatpush3.bf16.msra.mxu0 %v1185_v3  ;;  %1134 = vmatpush3.bf16.msra.mxu1 %v1185_v3  ;;  %v435_v40 = vsel %vm411_vm0, %v430_v33, %v434_v29  ;;  %v740_v48 = vsel %vm411_vm0, %v735_v41, %v739_v42  ;;  %v747_v51 = vor.u32 %v746_v44, %v742_v37  ;;  %v1177_v57 = vld [vmem:[%s1248_s27 + $0x50] ss:$0 sps:$4 sm:$0x11]   ;;  %v451_v58 = vshll.u32 %v1309_v47, 16 }
  0x1a   : > { %1111 = vmatprep.subr.bf16.mxu0 %v1186_v7  ;;  %1135 = vmatprep.subr.bf16.mxu1 %v1186_v7  ;;  %v751_v52 = vrot.slane %v749_v45, 1  ;;  %v442_v56 = vor.u32 %v441_v49, %v437_v39  ;;  %v446_v59 = vrot.slane %v444_v53, 1  ;;  %v754_v60 = vshrl.u32 %v1178_v50, 16  ;;  %v1179_v63 = vld [vmem:[%s1248_s27 + $0x44] ss:$0 sps:$4 sm:$0x11]  }
  0x1b   : > { %v453_v61 = vrot.slane %v451_v58, 1  ;;  %v456_v62 = vshll.u32 %v1177_v57, 16  ;;  %v756_v0 = vshll.u32 %v1178_v50, 16  ;;  %v761_v11 = vshll.u32 %v1179_v63, 16 }
  0x1c   : > { %689 = vrot.lane.b32.xlu0 %v423_v32, %s1198_s30  ;;  %462 = vrot.lane.b32.xlu1 %v435_v40, %s1199_s11  ;;  %v752_v1 = vsel %vm411_vm0, %v747_v51, %v751_v52  ;;  %v447_v2 = vsel %vm411_vm0, %v442_v56, %v446_v59  ;;  %v1181_v12 = vld [vmem:[%s1248_s27 + $0x5c] ss:$0 sps:$4 sm:$0x11]   ;;  %v768_v13 = vshll.u32 %v1180_v55, 16  ;;  %v766_v19 = vshrl.u32 %v1180_v55, 16 }
  0x1d   : > { %1112 = vmatpush3.bf16.msra.mxu0 %v1186_v7  ;;  %1136 = vmatpush3.bf16.msra.mxu1 %v1186_v7  ;;  %v454_v3 = vor.u32 %v453_v61, %v449_v54  ;;  %v458_v7 = vrot.slane %v456_v62, 1  ;;  %v758_v9 = vrot.slane %v756_v0, 1  ;;  %v773_v21 = vshll.u32 %v1181_v12, 16  ;;  %v1372_v55 = vld [vmem:[%s1428_s2] ss:$0 sm:$0xff] }
  0x1e   : > { %1113 = vmatprep.subr.bf16.mxu0 %v1187_v17  ;;  %1137 = vmatprep.subr.bf16.mxu1 %v1187_v17  ;;  %v770_v20 = vrot.slane %v768_v13, 1  ;;  %v1378_v61 = vld [vmem:[%s1429_s3] ss:$0 sm:$0xff] }
  0x1f   : > { %v759_v16 = vor.u32 %v758_v9, %v754_v60  ;;  %v459_v18 = vsel %vm411_vm0, %v454_v3, %v458_v7  ;;  %v775_v24 = vrot.slane %v773_v21, 1 }
  0x20   : > { %777 = vrot.lane.b32.xlu0 %v740_v48, %s1199_s11  ;;  %691 = vrot.lane.b32.xlu1 %v435_v40, %s1198_s30  ;;  %v771_v23 = vor.u32 %v770_v20, %v766_v19 }
  0x21   : > { %1114 = vmatpush3.bf16.msra.mxu0 %v1187_v17  ;;  %1138 = vmatpush3.bf16.msra.mxu1 %v1187_v17  ;;  %v763_v17 = vrot.slane %v761_v11, 1 }
  0x22   : > { %1115 = vmatprep.subr.bf16.mxu0 %v1188_v31  ;;  %1139 = vmatprep.subr.bf16.mxu1 %v1188_v31  ;;  %v776_v25 = vsel %vm411_vm0, %v771_v23, %v775_v24 }
  0x23   : > { %v764_v22 = vsel %vm411_vm0, %v759_v16, %v763_v17 }
  0x24   : > { %464 = vrot.lane.b32.xlu0 %v447_v2, %s1199_s11  ;;  %779 = vrot.lane.b32.xlu1 %v752_v1, %s1199_s11 }
  0x25   : > { %1116 = vmatpush3.bf16.msra.mxu0 %v1188_v31  ;;  %1140 = vmatpush3.bf16.msra.mxu1 %v1188_v31 }
  0x26   : > { %1117 = vmatprep.subr.bf16.mxu0 %v1189_v15  ;;  %1141 = vmatprep.subr.bf16.mxu1 %v1189_v15 }
  0x28   : > { %693 = vrot.lane.b32.xlu0 %v447_v2, %s1198_s30  ;;  %466 = vrot.lane.b32.xlu1 %v459_v18, %s1199_s11 }
  0x29   : > { %1118 = vmatpush3.bf16.msra.mxu0 %v1189_v15  ;;  %1142 = vmatpush3.bf16.msra.mxu1 %v1189_v15 }
  0x2c   : > { %781 = vrot.lane.b32.xlu0 %v764_v22, %s1199_s11  ;;  %695 = vrot.lane.b32.xlu1 %v459_v18, %s1198_s30 }
  0x30   : > { %783 = vrot.lane.b32.xlu1 %v776_v25, %s1199_s11 }
  0x82   : > { %v392_v26 = vpop.permute.xlu0 %391  ;;  %v398_v28 = vpop.permute.xlu1 %397 }
  0x83   : > { %v470_v31 = vsel %vm468_vm1, %v1270_v8, %v392_v26 }
  0x86   : > { %v394_v27 = vpop.permute.xlu0 %393 }
  0x87   : > { %v472_v36 = vsel %vm468_vm1, %v1281_v14, %v394_v27 }
  0x8a   : > { %v396_v29 = vpop.permute.xlu0 %395  ;;  %v461_v32 = vpop.permute.xlu1 %460 }
  0x8b   : > { %v479_v33 = vsel %vm477_vm2, %v470_v31, %v461_v32  ;;  %v474_v41 = vsel %vm468_vm1, %v1295_v30, %v396_v29  ;;  %v476_v30 = vsel %vm468_vm1, %v1309_v47, %v398_v28  ;;  %v225_v47 = vlaneseq }
  0x8c   : > { %1119 = vmatprep.mubr.msk.bf16.mxu0 %vm486_vm3, %v479_v33 }
  0x8d   : > { %v226_v54 = vshrl.u32 %v225_v47, 7 }
  0x8e   : > { %v690_v34 = vpop.permute.xlu0 %689  ;;  %v463_v37 = vpop.permute.xlu1 %462 }
  0x8f   : > { %v787_v35 = vsel %vm468_vm1, %v1254_v4, %v690_v34  ;;  %v481_v38 = vsel %vm477_vm2, %v472_v36, %v463_v37  ;;  %v229_v57 = vadd.s32 24, %v226_v54  ;;  %v228_v58 = vadd.s32 16, %v226_v54 }
  0x90   : > { %1120 = vmatmul.mubr.msk.bf16.vlgmr.msra.gmra.mxu0 %vm486_vm3, %v481_v38  ;;  %v238_v16 = vand.u32 15, %v226_v54  ;;  %v233_v31 = vadd.s32 56, %v226_v54  ;;  %v232_v36 = vadd.s32 48, %v226_v54 }
  0x91   : > { %v259_v63 = vand.u32 15, %v229_v57  ;;  %v252_v2 = vand.u32 15, %v228_v58 }
  0x92   : > { %v778_v39 = vpop.permute.xlu0 %777  ;;  %v692_v40 = vpop.permute.xlu1 %691  ;;  %vm645_vm7 = vcmp.ge.s32.totalorder %v238_v16, 1 }
  0x93   : > { %v798_v8 = vsel %vm477_vm2, %v787_v35, %v778_v39  ;;  %v790_v14 = vsel %vm468_vm1, %v1262_v6, %v692_v40  ;;  %vm656_vm4 = vcmp.lt.s32.totalorder %v259_v63, 9  ;;  %vm1394_vm5 = vcmp.ge.s32.totalorder %v252_v2, 1 }
  0x94   : > { %1143 = vmatprep.mubr.msk.bf16.mxu1 %vm486_vm3, %v798_v8  ;;  %v231_v8 = vadd.s32 40, %v226_v54 }
  0x96   : > { %v465_v42 = vpop.permute.xlu0 %464  ;;  %v780_v43 = vpop.permute.xlu1 %779 }
  0x97   : > { %v483_v4 = vsel %vm477_vm2, %v474_v41, %v465_v42  ;;  %v800_v44 = vsel %vm477_vm2, %v790_v14, %v780_v43  ;;  %v287_v14 = vand.u32 15, %v233_v31 }
  0x98   : > { %1123 = vmatprep.mubr.msk.bf16.mxu0 %vm486_vm3, %v483_v4  ;;  %1144 = vmatmul.mubr.msk.bf16.vlgmr.msra.gmra.mxu1 %vm486_vm3, %v800_v44 }
  0x99   : > { %vm660_vm8 = vcmp.lt.s32.totalorder %v287_v14, 9 }
  0x9a   : > { %v694_v45 = vpop.permute.xlu0 %693  ;;  %v467_v48 = vpop.permute.xlu1 %466 }
  0x9b   : > { %v793_v46 = vsel %vm468_vm1, %v1274_v10, %v694_v45  ;;  %v485_v49 = vsel %vm477_vm2, %v476_v30, %v467_v48  ;;  %v230_v45 = vadd.s32 32, %v226_v54  ;;  %v280_v30 = vand.u32 15, %v232_v36 }
  0x9c   : > { %1124 = vmatmul.mubr.msk.bf16.gmra.mxu0 %vm486_vm3, %v485_v49  ;;  %v273_v49 = vand.u32 15, %v231_v8 }
  0x9d   : > { %vm651_vm9 = vcmp.ge.s32.totalorder %v280_v30, 1 }
  0x9e   : > { %v782_v50 = vpop.permute.xlu0 %781  ;;  %v696_v51 = vpop.permute.xlu1 %695  ;;  %vm658_vm10 = vcmp.lt.s32.totalorder %v273_v49, 9 }
  0x9f   : > { %v802_v6 = vsel %vm477_vm2, %v793_v46, %v782_v50  ;;  %v796_v52 = vsel %vm468_vm1, %v1257_v5, %v696_v51  ;;  %v227_v5 = vadd.s32 8, %v226_v54 }
  0xa0   : > { %1147 = vmatprep.mubr.msk.bf16.mxu1 %vm486_vm3, %v802_v6 }
  0xa1   : > { %v245_v7 = vand.u32 15, %v227_v5 }
  0xa2   : > { %v784_v53 = vpop.permute.xlu1 %783 }
  0xa3   : > { %v804_v10 = vsel %vm477_vm2, %v796_v52, %v784_v53  ;;  %vm654_vm6 = vcmp.lt.s32.totalorder %v245_v7, 9 }
  0xa4   : > { %1148 = vmatmul.mubr.msk.bf16.gmra.mxu1 %vm486_vm3, %v804_v10  ;;  %v266_v10 = vand.u32 15, %v230_v45 }
  0xa6   : > { %vm649_vm11 = vcmp.ge.s32.totalorder %v266_v10, 1 }
 0x150   : > { %v1121_v56 = vpop.f32.mrf.mxu0 }
 0x151   : > { %v617_v59 = vmul.f32 %v1121_v56, %v1372_v55 }
 0x152   : > { %v578_v60 = vpop.f32.mrf.mxu0 }
 0x153   : > { %v615_v62 = vmul.f32 %v1372_v55, %v578_v60  ;;  %v631_v3 = vadd.f32 %v1378_v61, %v617_v59 }
 0x154   : > { %v1122_v0 = vpop.f32.mrf.mxu0 }
 0x155   : > { %v618_v1 = vmul.f32 %v1122_v0, %v1372_v55  ;;  %v629_v13 = vadd.f32 %v1378_v61, %v615_v62  ;;  %v639_v20 = vmax.f32 %v631_v3, 0.0 }
 0x156   : > { %v581_v9 = vpop.f32.mrf.mxu0 }
 0x157   : > { %v632_v11 = vadd.f32 %v1378_v61, %v618_v1  ;;  %v616_v12 = vmul.f32 %v1372_v55, %v581_v9  ;;  %v637_v27 = vmax.f32 %v629_v13, 0.0  ;;  %v671_v35 = vsel %vm1394_vm5, %v639_v20, -inf }
 0x158   : > { %v1145_v15 = vpop.f32.mrf.mxu1 }
 0x159   : > { %v640_v17 = vmax.f32 %v632_v11, 0.0  ;;  %v630_v18 = vadd.f32 %v1378_v61, %v616_v12  ;;  %v880_v19 = vmul.f32 %v1145_v15, %v1372_v55  ;;  %v669_v42 = vsel %vm645_vm7, %v637_v27, -inf }
 0x15a   : > { %v847_v22 = vpop.f32.mrf.mxu1 }
 0x15b   : > { %v672_v23 = vsel %vm656_vm4, %v640_v17, -inf  ;;  %v638_v24 = vmax.f32 %v630_v18, 0.0  ;;  %v888_v25 = vadd.f32 %v1378_v61, %v880_v19  ;;  %v878_v26 = vmul.f32 %v1372_v55, %v847_v22 }
 0x15c   : > { %945 = vst [vmem:[%s1390_s23 + $0x18] sm:$0x1] %v672_v23  ;;  %v1125_v28 = vpop.f32.mrf.mxu0  ;;  %v1146_v29 = vpop.f32.mrf.mxu1 }
 0x15d   : > { %v670_v32 = vsel %vm654_vm6, %v638_v24, -inf  ;;  %v896_v33 = vmax.f32 %v888_v25, 0.0  ;;  %v886_v34 = vadd.f32 %v1378_v61, %v878_v26  ;;  %v621_v37 = vmul.f32 %v1125_v28, %v1372_v55 }
 0x15e   : > { %943 = vst [vmem:[%s1390_s23 + $0x8] sm:$0x1] %v670_v32  ;;  %v594_v38 = vpop.f32.mrf.mxu0  ;;  %v850_v39 = vpop.f32.mrf.mxu1 }
 0x15f   : > { %v936_v40 = vmax.f32 %v671_v35, %v896_v33  ;;  %v894_v41 = vmax.f32 %v886_v34, 0.0  ;;  %v619_v4 = vmul.f32 %v1372_v55, %v594_v38  ;;  %v635_v48 = vadd.f32 %v1378_v61, %v621_v37 }
 0x160   : > { %v1126_v43 = vpop.f32.mrf.mxu0 }
 0x161   : > { %944 = vst [vmem:[%s1390_s23 + $0x10] sm:$0xff] %v936_v40  ;;  %v934_v44 = vmax.f32 %v669_v42, %v894_v41  ;;  %v622_v46 = vmul.f32 %v1126_v43, %v1372_v55  ;;  %v633_v52 = vadd.f32 %v1378_v61, %v619_v4  ;;  %v643_v57 = vmax.f32 %v635_v48, 0.0 }
 0x162   : > { %v597_v50 = vpop.f32.mrf.mxu0 }
 0x163   : > { %942 = vst [vmem:[%s1390_s23] sm:$0xff] %v934_v44  ;;  %v636_v6 = vadd.f32 %v1378_v61, %v622_v46  ;;  %v620_v51 = vmul.f32 %v1372_v55, %v597_v50  ;;  %v641_v63 = vmax.f32 %v633_v52, 0.0  ;;  %v675_v7 = vsel %vm651_vm9, %v643_v57, -inf }
 0x164   : > { %v1149_v53 = vpop.f32.mrf.mxu1 }
 0x165   : > { %v644_v47 = vmax.f32 %v636_v6, 0.0  ;;  %v634_v54 = vadd.f32 %v1378_v61, %v620_v51  ;;  %v884_v56 = vmul.f32 %v1149_v53, %v1372_v55  ;;  %v673_v13 = vsel %vm649_vm11, %v641_v63, -inf }
 0x166   : > { %v863_v58 = vpop.f32.mrf.mxu1 }
 0x167   : > { %v676_v59 = vsel %vm660_vm8, %v644_v47, -inf  ;;  %v642_v60 = vmax.f32 %v634_v54, 0.0  ;;  %v892_v5 = vadd.f32 %v1378_v61, %v884_v56  ;;  %v882_v62 = vmul.f32 %v1372_v55, %v863_v58 }
 0x168   : > { %949 = vst [vmem:[%s1390_s23 + $0x38] sm:$0x1] %v676_v59  ;;  %v1150_v0 = vpop.f32.mrf.mxu1 }
 0x169   : > { %v674_v1 = vsel %vm658_vm10, %v642_v60, -inf  ;;  %v900_v2 = vmax.f32 %v892_v5, 0.0  ;;  %v890_v3 = vadd.f32 %v1378_v61, %v882_v62 }
 0x16a   : > { %947 = vst [vmem:[%s1390_s23 + $0x28] sm:$0x1] %v674_v1  ;;  %v866_v9 = vpop.f32.mrf.mxu1 }
 0x16b   : > { %v940_v11 = vmax.f32 %v675_v7, %v900_v2  ;;  %v898_v12 = vmax.f32 %v890_v3, 0.0 }
 0x16d   : > { %948 = vst [vmem:[%s1390_s23 + $0x30] sm:$0xff] %v940_v11  ;;  %v938_v15 = vmax.f32 %v673_v13, %v898_v12 }
 0x16f   : > { %946 = vst [vmem:[%s1390_s23 + $0x20] sm:$0xff] %v938_v15 }
 0x170 PF: > { %s14_s15 = sadd.s32 1, %s1196_s15  }
 0x171   : > { %p11_p4 = scmp.ge.s32.totalorder %s14_s15, 6  }
 0x173   :  { %13 = sbr.rel (!%p11_p4) target bundleno = 1 (0x1), region = 67 }

</bundles_post_ra>
